<compile_context>
chip_gen: v7x
topology: tpu7x:2x2x1
jax: 0.10.0
libtpu: 0.0.40
codegen_flags: <defaults>
</compile_context>

<pallas_src>
import functools

import jax
import jax.numpy as jnp
import numpy as np
from jax.experimental import pallas as pl
from jax.experimental.pallas import tpu as pltpu

D_FEAT = 150          # fc1/fc3 in_features
D_HID = 75            # hidden dim
D_ALPHA = 2           # fc2 out_features
D_EMBED = 32          # stands in for config['u2u']['d_embed']


def _round_up(x, m):
    return (x + m - 1) // m * m


def _custom_mu2_kernel(feat_ref, left_ref, right_ref,
                       w13_ref, b13_ref, w2_ref, b2_ref, w4_ref, b4_ref,
                       out_ref, *, n_pad):
    feat = feat_ref[...]                                                 # [TB, 150]

    # Fused fc1/fc3: one MXU push (K=150, N=150), f32 accumulation.
    h = jnp.dot(feat.astype(w13_ref.dtype), w13_ref[...],
                preferred_element_type=jnp.float32) + b13_ref[...]
    h = jnp.maximum(h, 0.0)                                              # [TB, 150] f32

    # Alpha (fc2) always in f32: the row selection is a discontinuous decision,
    # so it stays f32 even when the big matmuls run in bf16 (review concern).
    # w2 is zero-padded to K=150 rows; the exact-zero rows contribute exact 0s.
    alpha = jnp.dot(h, w2_ref[...],
                    preferred_element_type=jnp.float32) + b2_ref[...]    # [TB, 2]

    # Embed (fc4): zero-padded to K=150 so no lane-misaligned slice of h.
    embed = jnp.dot(h.astype(w4_ref.dtype), w4_ref[...],
                    preferred_element_type=jnp.float32) + b4_ref[...]    # [TB, d_embed]

    # torch.argmax returns the first max index on ties -> ties pick left -> `>=`.
    # TODO(synk): a NaN alpha selects `right` here; torch.argmax would pick left.
    take_left = alpha[:, 0:1] >= alpha[:, 1:2]                           # [TB, 1]
    sel = jnp.where(take_left, left_ref[...], right_ref[...])           # [TB, F]

    # Single full-block (lane-contiguous) store.
    pieces = [sel.astype(out_ref.dtype), embed.astype(out_ref.dtype)]
    if n_pad:
        pieces.append(jnp.zeros((sel.shape[0], n_pad), out_ref.dtype))
    out_ref[...] = jnp.concatenate(pieces, axis=-1)


def init_params(key):
    """Deterministic nn.Linear-style init: U(-1/sqrt(in), 1/sqrt(in))."""
    ks = jax.random.split(key, 8)

    def linear(kw, kb, din, dout):
        bound = 1.0 / float(np.sqrt(din))
        w = jax.random.uniform(kw, (din, dout), jnp.float32, -bound, bound)
        b = jax.random.uniform(kb, (1, dout), jnp.float32, -bound, bound)
        return w, b

    w1, b1 = linear(ks[0], ks[1], D_FEAT, D_HID)
    w2, b2 = linear(ks[2], ks[3], D_HID, D_ALPHA)
    w3, b3 = linear(ks[4], ks[5], D_FEAT, D_HID)
    w4, b4 = linear(ks[6], ks[7], D_HID, D_EMBED)
    return dict(w1=w1, b1=b1, w2=w2, b2=b2, w3=w3, b3=b3, w4=w4, b4=b4)


def _fuse_params(p, matmul_dtype):
    """Host-side weight fusion / zero-padding (constant-folded under jit)."""
    d_embed = p["w4"].shape[1]
    # fc1/fc3 fused -> one [150, 150] matmul.
    w13 = jnp.concatenate([p["w1"], p["w3"]], axis=1).astype(matmul_dtype)
    b13 = jnp.concatenate([p["b1"], p["b3"]], axis=1).astype(jnp.float32)
    # fc2 stays f32 (selection stability); zero-padded to K=150 rows.
    w2p = jnp.zeros((2 * D_HID, D_ALPHA), jnp.float32)
    w2p = w2p.at[:D_HID].set(p["w2"].astype(jnp.float32))
    b2 = p["b2"].astype(jnp.float32)
    # fc4 zero-padded to K=150 rows; exact-zero rows add exact zeros.
    w4p = jnp.zeros((2 * D_HID, d_embed), matmul_dtype)
    w4p = w4p.at[D_HID:].set(p["w4"].astype(matmul_dtype))
    b4 = p["b4"].astype(jnp.float32)
    return w13, b13, w2p, b2, w4p, b4


def _choose_tile(B, per_row_bytes, resident_bytes, block_b):
    """Batch tile from an explicit VMEM budget (v7x-aware) + megacore shaping."""
    budget = 32 << 20                      # fits v7x's scoped default; fine on v5e/v6e
    avail = max(budget - 2 * resident_bytes, 1 << 20)
    tb_cap = max(8, (avail // (2 * per_row_bytes)) // 8 * 8)   # 2x: double-buffered
    tb = min(_round_up(block_b, 8), tb_cap)
    # v7x megacore: keep >= 2 grid steps whenever the batch allows it so the
    # "parallel" batch axis can be sharded across both TensorCores.
    if B > 8:
        tb = min(tb, _round_up(pl.cdiv(B, 2), 8))
    tb = max(8, min(tb, _round_up(B, 8)))
    return tb


def custom_mu2_forward(features, left, right, params, *,
                       block_b=2048,
                       matmul_dtype=jnp.bfloat16,
                       out_dtype=jnp.float32,
                       pad_output_lanes=False):
    B = features.shape[0]
    F = left.shape[-1]
    d_embed = params["w4"].shape[1]
    d_out = F + d_embed
    d_out_p = _round_up(d_out, 128) if pad_output_lanes else d_out
    n_pad = d_out_p - d_out

    weights = _fuse_params(params, matmul_dtype)
    w13, b13, w2p, b2, w4p, b4 = weights

    out_itemsize = np.dtype(out_dtype).itemsize
    per_row_bytes = (features.dtype.itemsize * D_FEAT
                     + left.dtype.itemsize * F
                     + right.dtype.itemsize * F
                     + out_itemsize * d_out_p)
    resident_bytes = sum(int(w.size) * w.dtype.itemsize for w in weights)

    tb = _choose_tile(B, per_row_bytes, resident_bytes, block_b)
    grid = (pl.cdiv(B, tb),)   # ragged tail handled by Pallas boundary masking

    # Explicit scoped-VMEM limit derived from the tile (cap safe for v7x 64 MiB).
    vmem_need = 2 * tb * per_row_bytes + 2 * resident_bytes
    vmem_limit = int(min(max(vmem_need + (4 << 20), 32 << 20), 48 << 20))

    flops = 2 * B * D_FEAT * (2 * D_HID + D_ALPHA + d_embed)
    bytes_accessed = B * per_row_bytes + resident_bytes

    kernel = functools.partial(_custom_mu2_kernel, n_pad=n_pad)

    out = pl.pallas_call(
        kernel,
        out_shape=jax.ShapeDtypeStruct((B, d_out_p), out_dtype),
        grid=grid,
        in_specs=[
            pl.BlockSpec((tb, D_FEAT), lambda i: (i, 0)),   # features (tiled)
            pl.BlockSpec((tb, F), lambda i: (i, 0)),        # left     (tiled)
            pl.BlockSpec((tb, F), lambda i: (i, 0)),        # right    (tiled)
            pl.BlockSpec(w13.shape, lambda i: (0, 0)),      # w13 (VMEM-resident)
            pl.BlockSpec(b13.shape, lambda i: (0, 0)),      # b13
            pl.BlockSpec(w2p.shape, lambda i: (0, 0)),      # w2 (f32)
            pl.BlockSpec(b2.shape, lambda i: (0, 0)),       # b2
            pl.BlockSpec(w4p.shape, lambda i: (0, 0)),      # w4
            pl.BlockSpec(b4.shape, lambda i: (0, 0)),       # b4
        ],
        out_specs=pl.BlockSpec((tb, d_out_p), lambda i: (i, 0)),
        compiler_params=pltpu.CompilerParams(
            dimension_semantics=("parallel",),              # megacore on v7x
            vmem_limit_bytes=vmem_limit),
        cost_estimate=pl.CostEstimate(
            flops=flops, transcendentals=0, bytes_accessed=bytes_accessed),
    )(features, left, right, *weights)

    if n_pad:
        out = out[:, :d_out]   # only taken with pad_output_lanes=True (v7x option)
    return out


def _reference_forward(features, left, right, p):
    """Pure-JAX reference matching the torch module (unfused f32 weights)."""
    h1 = jnp.maximum(features @ p["w1"] + p["b1"], 0.0)
    alpha = h1 @ p["w2"] + p["b2"]
    h2 = jnp.maximum(features @ p["w3"] + p["b3"], 0.0)
    embed = h2 @ p["w4"] + p["b4"]
    flatten = jnp.stack([left, right], axis=1)                 # [B, 2, F]
    idx = jnp.argmax(alpha[..., None], axis=1, keepdims=True)  # [B, 1, 1]
    idx = jnp.broadcast_to(idx, (flatten.shape[0], 1, flatten.shape[-1]))
    action = jnp.take_along_axis(flatten, idx, axis=1)[:, 0, :]
    return jnp.concatenate([action, embed], axis=1)


if __name__ == "__main__":
    key = jax.random.PRNGKey(0)
    kp, kf, kl, kr = jax.random.split(key, 4)
    params = init_params(kp)

    # Small, single-tile case; f32 matmuls -> tight check against the reference.
    B, F = 8, 16
    features = jax.random.normal(kf, (B, D_FEAT), jnp.float32)
    left = jax.random.normal(kl, (B, F), jnp.float32)
    right = jax.random.normal(kr, (B, F), jnp.float32)
    out = jax.block_until_ready(
        custom_mu2_forward(features, left, right, params,
                           matmul_dtype=jnp.float32))
    ref = _reference_forward(features, left, right, params)
    np.testing.assert_allclose(np.asarray(out), np.asarray(ref),
                               rtol=1e-5, atol=1e-5)

    # Ragged multi-tile case (B=200 doesn't divide the tile): exercises the
    # cdiv grid + masked boundary block -- no host-side pad / slice copies.
    B2 = 200
    k2f, k2l, k2r = jax.random.split(jax.random.PRNGKey(1), 3)
    features2 = jax.random.normal(k2f, (B2, D_FEAT), jnp.float32)
    left2 = jax.random.normal(k2l, (B2, F), jnp.float32)
    right2 = jax.random.normal(k2r, (B2, F), jnp.float32)
    out2 = jax.block_until_ready(
        custom_mu2_forward(features2, left2, right2, params,
                           matmul_dtype=jnp.float32))
    ref2 = _reference_forward(features2, left2, right2, params)
    np.testing.assert_allclose(np.asarray(out2), np.asarray(ref2),
                               rtol=1e-5, atol=1e-5)

    # Default bf16 matmul path: embed within loose tolerance; each action row
    # must be exactly the corresponding left or right row (f32 select, f32 out).
    out3 = jax.block_until_ready(
        custom_mu2_forward(features2, left2, right2, params))
    embed_err = np.abs(np.asarray(out3[:, F:]) - np.asarray(ref2[:, F:]))
    assert float(np.max(embed_err)) < 5e-2, "bf16 embed path out of tolerance"
    act = np.asarray(out3[:, :F])
    is_left = np.all(act == np.asarray(left2), axis=1)
    is_right = np.all(act == np.asarray(right2), axis=1)
    assert bool(np.all(is_left | is_right)), "bf16 path emitted a mixed row"

    print("KERNEL_OK")
</pallas_src>

<mosaic_0001>
module attributes {stable_mosaic.version = 11 : i64} {
  func.func @_custom_mu2_kernel(%arg0: i32, %arg1: memref<8x150xf32, #tpu.memory_space<vmem>>, %arg2: memref<8x16xf32, #tpu.memory_space<vmem>>, %arg3: memref<8x16xf32, #tpu.memory_space<vmem>>, %arg4: memref<150x150xf32, #tpu.memory_space<vmem>>, %arg5: memref<1x150xf32, #tpu.memory_space<vmem>>, %arg6: memref<150x2xf32, #tpu.memory_space<vmem>>, %arg7: memref<1x2xf32, #tpu.memory_space<vmem>>, %arg8: memref<150x32xf32, #tpu.memory_space<vmem>>, %arg9: memref<1x32xf32, #tpu.memory_space<vmem>>, %arg10: memref<8x48xf32, #tpu.memory_space<vmem>>) attributes {dimension_semantics = [#tpu.dimension_semantics<parallel>], iteration_bounds = array<i64: 1>, scalar_prefetch = 0 : i64, scratch_operands = 0 : i64, tpu.core_type = #tpu.core_type<tc>, window_params = [{transform_indices = @transform_0, window_bounds = array<i64: 8, 150>}, {transform_indices = @transform_1, window_bounds = array<i64: 8, 16>}, {transform_indices = @transform_2, window_bounds = array<i64: 8, 16>}, {pipeline_mode = #tpu.pipeline_mode<synchronous>, transform_indices = @transform_3, window_bounds = array<i64: 150, 150>}, {pipeline_mode = #tpu.pipeline_mode<synchronous>, transform_indices = @transform_4, window_bounds = array<i64: 1, 150>}, {pipeline_mode = #tpu.pipeline_mode<synchronous>, transform_indices = @transform_5, window_bounds = array<i64: 150, 2>}, {pipeline_mode = #tpu.pipeline_mode<synchronous>, transform_indices = @transform_6, window_bounds = array<i64: 1, 2>}, {pipeline_mode = #tpu.pipeline_mode<synchronous>, transform_indices = @transform_7, window_bounds = array<i64: 150, 32>}, {pipeline_mode = #tpu.pipeline_mode<synchronous>, transform_indices = @transform_8, window_bounds = array<i64: 1, 32>}, {transform_indices = @transform_9, window_bounds = array<i64: 8, 48>}]} {
    %c0 = arith.constant 0 : index
    %c0_0 = arith.constant 0 : index
    %0 = vector.load %arg1[%c0, %c0_0] : memref<8x150xf32, #tpu.memory_space<vmem>>, vector<8x150xf32>
    %c0_1 = arith.constant 0 : index
    %c0_2 = arith.constant 0 : index
    %1 = vector.load %arg4[%c0_1, %c0_2] : memref<150x150xf32, #tpu.memory_space<vmem>>, vector<150x150xf32>
    %cst = arith.constant dense<0.000000e+00> : vector<8x150xf32>
    %2 = tpu.matmul %0, %1, %cst {dimension_numbers = #tpu.dot_dimension_numbers<[1], [0], [0], [1], [0, 0, 1, 1], [], []>} : vector<8x150xf32>, vector<150x150xf32>, vector<8x150xf32> -> vector<8x150xf32>
    %c0_3 = arith.constant 0 : index
    %c0_4 = arith.constant 0 : index
    %3 = vector.load %arg5[%c0_3, %c0_4] : memref<1x150xf32, #tpu.memory_space<vmem>>, vector<1x150xf32>
    %4 = vector.broadcast %3 : vector<1x150xf32> to vector<8x150xf32>
    %5 = arith.addf %2, %4 : vector<8x150xf32>
    %cst_5 = arith.constant 0.000000e+00 : f32
    %6 = vector.broadcast %cst_5 : f32 to vector<8x150xf32>
    %7 = arith.maximumf %5, %6 : vector<8x150xf32>
    %c0_6 = arith.constant 0 : index
    %c0_7 = arith.constant 0 : index
    %8 = vector.load %arg6[%c0_6, %c0_7] : memref<150x2xf32, #tpu.memory_space<vmem>>, vector<150x2xf32>
    %cst_8 = arith.constant dense<0.000000e+00> : vector<8x2xf32>
    %9 = tpu.matmul %7, %8, %cst_8 {dimension_numbers = #tpu.dot_dimension_numbers<[1], [0], [0], [1], [0, 0, 1, 1], [], []>} : vector<8x150xf32>, vector<150x2xf32>, vector<8x2xf32> -> vector<8x2xf32>
    %c0_9 = arith.constant 0 : index
    %c0_10 = arith.constant 0 : index
    %10 = vector.load %arg7[%c0_9, %c0_10] : memref<1x2xf32, #tpu.memory_space<vmem>>, vector<1x2xf32>
    %11 = vector.broadcast %10 : vector<1x2xf32> to vector<8x2xf32>
    %12 = arith.addf %9, %11 : vector<8x2xf32>
    %c0_11 = arith.constant 0 : index
    %c0_12 = arith.constant 0 : index
    %13 = vector.load %arg8[%c0_11, %c0_12] : memref<150x32xf32, #tpu.memory_space<vmem>>, vector<150x32xf32>
    %cst_13 = arith.constant dense<0.000000e+00> : vector<8x32xf32>
    %14 = tpu.matmul %7, %13, %cst_13 {dimension_numbers = #tpu.dot_dimension_numbers<[1], [0], [0], [1], [0, 0, 1, 1], [], []>} : vector<8x150xf32>, vector<150x32xf32>, vector<8x32xf32> -> vector<8x32xf32>
    %c0_14 = arith.constant 0 : index
    %c0_15 = arith.constant 0 : index
    %15 = vector.load %arg9[%c0_14, %c0_15] : memref<1x32xf32, #tpu.memory_space<vmem>>, vector<1x32xf32>
    %16 = vector.broadcast %15 : vector<1x32xf32> to vector<8x32xf32>
    %17 = arith.addf %14, %16 : vector<8x32xf32>
    %18 = vector.extract_strided_slice %12 {offsets = [0, 0], sizes = [8, 1], strides = [1, 1]} : vector<8x2xf32> to vector<8x1xf32>
    %19 = vector.extract_strided_slice %12 {offsets = [0, 1], sizes = [8, 1], strides = [1, 1]} : vector<8x2xf32> to vector<8x1xf32>
    %20 = arith.cmpf oge, %18, %19 : vector<8x1xf32>
    %c0_16 = arith.constant 0 : index
    %c0_17 = arith.constant 0 : index
    %21 = vector.load %arg2[%c0_16, %c0_17] : memref<8x16xf32, #tpu.memory_space<vmem>>, vector<8x16xf32>
    %c0_18 = arith.constant 0 : index
    %c0_19 = arith.constant 0 : index
    %22 = vector.load %arg3[%c0_18, %c0_19] : memref<8x16xf32, #tpu.memory_space<vmem>>, vector<8x16xf32>
    %23 = vector.shape_cast %20 : vector<8x1xi1> to vector<8x1xi1>
    %24 = vector.broadcast %23 : vector<8x1xi1> to vector<8x16xi1>
    %25 = arith.select %24, %21, %22 : vector<8x16xi1>, vector<8x16xf32>
    %26 = tpu.concatenate %25, %17 in 1 : vector<8x16xf32>, vector<8x32xf32> -> vector<8x48xf32>
    %c0_20 = arith.constant 0 : index
    %c0_21 = arith.constant 0 : index
    %27 = vector.load %arg10[%c0_20, %c0_21] : memref<8x48xf32, #tpu.memory_space<vmem>>, vector<8x48xf32>
    tpu.vector_store %arg10[%c0_20, %c0_21], %26 {strides = array<i32>} : memref<8x48xf32, #tpu.memory_space<vmem>>, vector<8x48xf32>,
    return
  }
  func.func @transform_0(%arg0: i32) -> (i32, i32) {
    %c0_i32 = arith.constant 0 : i32
    %c0_i32_0 = arith.constant 0 : i32
    return %arg0, %c0_i32 : i32, i32
  }
  func.func @transform_1(%arg0: i32) -> (i32, i32) {
    %c0_i32 = arith.constant 0 : i32
    %c0_i32_0 = arith.constant 0 : i32
    return %arg0, %c0_i32 : i32, i32
  }
  func.func @transform_2(%arg0: i32) -> (i32, i32) {
    %c0_i32 = arith.constant 0 : i32
    %c0_i32_0 = arith.constant 0 : i32
    return %arg0, %c0_i32 : i32, i32
  }
  func.func @transform_3(%arg0: i32) -> (i32, i32) {
    %c0_i32 = arith.constant 0 : i32
    %c0_i32_0 = arith.constant 0 : i32
    %c0_i32_1 = arith.constant 0 : i32
    return %c0_i32, %c0_i32_0 : i32, i32
  }
  func.func @transform_4(%arg0: i32) -> (i32, i32) {
    %c0_i32 = arith.constant 0 : i32
    %c0_i32_0 = arith.constant 0 : i32
    %c0_i32_1 = arith.constant 0 : i32
    return %c0_i32, %c0_i32_0 : i32, i32
  }
  func.func @transform_5(%arg0: i32) -> (i32, i32) {
    %c0_i32 = arith.constant 0 : i32
    %c0_i32_0 = arith.constant 0 : i32
    %c0_i32_1 = arith.constant 0 : i32
    return %c0_i32, %c0_i32_0 : i32, i32
  }
  func.func @transform_6(%arg0: i32) -> (i32, i32) {
    %c0_i32 = arith.constant 0 : i32
    %c0_i32_0 = arith.constant 0 : i32
    %c0_i32_1 = arith.constant 0 : i32
    return %c0_i32, %c0_i32_0 : i32, i32
  }
  func.func @transform_7(%arg0: i32) -> (i32, i32) {
    %c0_i32 = arith.constant 0 : i32
    %c0_i32_0 = arith.constant 0 : i32
    %c0_i32_1 = arith.constant 0 : i32
    return %c0_i32, %c0_i32_0 : i32, i32
  }
  func.func @transform_8(%arg0: i32) -> (i32, i32) {
    %c0_i32 = arith.constant 0 : i32
    %c0_i32_0 = arith.constant 0 : i32
    %c0_i32_1 = arith.constant 0 : i32
    return %c0_i32, %c0_i32_0 : i32, i32
  }
  func.func @transform_9(%arg0: i32) -> (i32, i32) {
    %c0_i32 = arith.constant 0 : i32
    %c0_i32_0 = arith.constant 0 : i32
    return %arg0, %c0_i32 : i32, i32
  }
}

</mosaic_0001>

<bundles_post_ra>
// kernel: tpu_custom_call.1
= control target key start
LH: loop header
LB: loop body
LE: loop exit
PB: predicated region body
PF: predicated region fallthrough
CT: control target
= control target key end

     0   :  { %14 = vsyncpa [#allocation3], 0  ;;  %s973_s0 = inlined_call_operand.vmem [shape: f32[8,150], index: 0, kind: input, shape index: {}]   ;;  %s974_s1 = inlined_call_operand.hbm [shape: f32[8,16], index: 1, kind: input, shape index: {}]   ;;  %s975_s2 = inlined_call_operand.hbm [shape: f32[8,16], index: 2, kind: input, shape index: {}]   ;;  %s976_s3 = inlined_call_operand.vmem [shape: f32[150,150], index: 3, kind: input, shape index: {}]   ;;  %s977_s4 = inlined_call_operand.vmem [shape: f32[1,150], index: 4, kind: input, shape index: {}]   ;;  %s978_s5 = inlined_call_operand.vmem [shape: f32[150,2], index: 5, kind: input, shape index: {}]   ;;  %s979_s6 = inlined_call_operand.vmem [shape: f32[1,2], index: 6, kind: input, shape index: {}]   ;;  %s980_s7 = inlined_call_operand.vmem [shape: f32[150,32], index: 7, kind: input, shape index: {}]   ;;  %s981_s8 = inlined_call_operand.vmem [shape: f32[1,32], index: 8, kind: input, shape index: {}]   ;;  %s982_s9 = inlined_call_operand.hbm [shape: f32[8,48], index: 9, kind: output, shape index: {}]  }
   0x1   :  { %15 = vsyncpa [#allocation6], 0 }
   0x2   :  { %16 = vsyncpa [#allocation4], 0  ;;  %s611_s30 = smov [#allocation2]   ;;  %s612_s11 = smov [#allocation5]  }
   0x3   :  { %s25_s10 = sshll.u32 %s611_s30, 4  ;;  %s35_s12 = sshll.u32 %s612_s11, 4  ;;  %s26_s10 = int_to_ptr.vmem [resolvable:$true] %s25_s10  ;;  %s36_s12 = int_to_ptr.vmem [resolvable:$true] %s35_s12 }
   0x4   :  { %s539_s15 = scalar_lea.hbm %s974_s1, 128 }
   0x5   :  { %p540_p0 = scmp.ne.s32.totalorder %s974_s1, %s539_s15  ;;  %p543_p1 = scmp.lt.u32.totalorder %s539_s15, %s974_s1 }
   0x7   :  { %p545_p2 = pnand %p543_p1, %p540_p0 }
   0x9   :  { %548 = shalt.err (!%p545_p2)
}
   0xa   :  { %s549_s20 = scalar_lea.vmem %s26_s10, 128  ;;  %p554_p4 = scmp.lt.s32.totalorder %s26_s10, %s26_s10 }
   0xb   :  { %p550_p3 = scmp.ne.s32.totalorder %s26_s10, %s549_s20  ;;  %p555_p5 = scmp.lt.s32.totalorder %s549_s20, %s549_s20 }
   0xd   :  { %p556_p6 = por %p555_p5, %p554_p4 }
   0xf   :  { %p557_p7 = pnand %p556_p6, %p550_p3 }
  0x11   :  { %560 = shalt.err (!%p557_p7)
}
  0x12   :  { %28 = dma.hbm_to_vmem [thread:$0]  %s974_s1, 128, %s26_s10, [#allocation3]  }
  0x13   :  { %s561_s25 = scalar_lea.hbm %s975_s2, 128 }
  0x14   :  { %p562_p8 = scmp.ne.s32.totalorder %s975_s2, %s561_s25  ;;  %p565_p9 = scmp.lt.u32.totalorder %s561_s25, %s975_s2 }
  0x16   :  { %p567_p10 = pnand %p565_p9, %p562_p8 }
  0x18   :  { %570 = shalt.err (!%p567_p10)
}
  0x19   :  { %s571_s30 = scalar_lea.vmem %s36_s12, 128  ;;  %p576_p12 = scmp.lt.s32.totalorder %s36_s12, %s36_s12 }
  0x1a   :  { %p572_p11 = scmp.ne.s32.totalorder %s36_s12, %s571_s30  ;;  %p577_p13 = scmp.lt.s32.totalorder %s571_s30, %s571_s30 }
  0x1c   :  { %p578_p0 = por %p577_p13, %p576_p12 }
  0x1e   :  { %p579_p1 = pnand %p578_p0, %p572_p11 }
  0x20   :  { %582 = shalt.err (!%p579_p1)
}
  0x21   :  { %38 = dma.hbm_to_vmem [thread:$0]  %s975_s2, 128, %s36_s12, [#allocation6]  }
  0x22   :  { %605 = dma.done.wait [#allocation3], 128  }
  0x23   :  { %606 = vsyncadd [#allocation3], 4294967168 }
  0x24   :  { %607 = dma.done.wait [#allocation6], 128  }
  0x25   :  { %608 = vsyncadd [#allocation6], 4294967168  ;;  %v613_v0 = vmov 0.0|0.0   ;;  %v60_v1 = vld [vmem:[%s976_s3 + $0x8] sm:$0xff]  ;;  %v62_v2 = vld [vmem:[%s976_s3 + $0x18] sm:$0xff]  ;;  %vm109_vm0 = vcmask 179200  }
  0x26   :  { %476 = vmatprep.subr.bf16.mxu1 %v613_v0  ;;  %v59_v3 = vld [vmem:[%s976_s3] sm:$0xff]  ;;  %v440_v4 = vpack.c.bf16 %v62_v2, %v60_v1  ;;  %v61_v5 = vld [vmem:[%s976_s3 + $0x10] sm:$0xff]  ;;  %v64_v6 = vld [vmem:[%s976_s3 + $0x28] sm:$0xff]  ;;  %vm113_vm1 = vcmask 1045504   ;;  %s616_s27 = smov 16   ;;  %s617_s28 = smov 127  }
  0x27   :  { %v66_v7 = vld [vmem:[%s976_s3 + $0x38] sm:$0xff]  ;;  %v442_v8 = vpack.c.bf16 %v61_v5, %v59_v3  ;;  %v63_v10 = vld [vmem:[%s976_s3 + $0x20] sm:$0xff]  ;;  %v65_v11 = vld [vmem:[%s976_s3 + $0x30] sm:$0xff]  ;;  %vm411_vm3 = vcmask 130048   ;;  %vm413_vm5 = vcmask 392192  }
  0x28   :  { %v444_v9 = vpack.c.bf16 %v66_v7, %v64_v6  ;;  %v68_v12 = vld [vmem:[%s976_s3 + $0x48] sm:$0xff]  ;;  %441 = vmatprep.subr.bf16.mxu0 %v440_v4  ;;  %v70_v13 = vld [vmem:[%s976_s3 + $0x58] sm:$0xff]  ;;  %v446_v14 = vpack.c.bf16 %v65_v11, %v63_v10  ;;  %v67_v16 = vld [vmem:[%s976_s3 + $0x40] sm:$0xff] }
  0x29   :  { %443 = vmatpush1.bf16.msra.mxu0 %v442_v8  ;;  %v448_v15 = vpack.c.bf16 %v70_v13, %v68_v12  ;;  %v69_v17 = vld [vmem:[%s976_s3 + $0x50] sm:$0xff]  ;;  %v72_v18 = vld [vmem:[%s976_s3 + $0x68] sm:$0xff]  ;;  %v74_v19 = vld [vmem:[%s976_s3 + $0x78] sm:$0xff] }
  0x2a   :  { %445 = vmatprep.subr.bf16.mxu0 %v444_v9  ;;  %v450_v20 = vpack.c.bf16 %v69_v17, %v67_v16  ;;  %v452_v21 = vpack.c.bf16 %v74_v19, %v72_v18  ;;  %v71_v22 = vld [vmem:[%s976_s3 + $0x60] sm:$0xff]  ;;  %v73_v23 = vld [vmem:[%s976_s3 + $0x70] sm:$0xff]  ;;  %v76_v24 = vld [vmem:[%s976_s3 + $0x88] sm:$0xff] }
  0x2b   :  { %v78_v25 = vld [vmem:[%s976_s3 + $0x98] sm:$0xff]  ;;  %v454_v26 = vpack.c.bf16 %v73_v23, %v71_v22  ;;  %v75_v27 = vld [vmem:[%s976_s3 + $0x80] sm:$0xff]  ;;  %v58_v28 = vld [vmem:[%s973_s0 + $0x8] sm:$0xff] }
  0x2c   :  { %v456_v29 = vpack.c.bf16 %v78_v25, %v76_v24  ;;  %v77_v30 = vld [vmem:[%s976_s3 + $0x90] sm:$0xff]  ;;  %433 = vmatprep.mubr.msk.f32.mxu0 %vm109_vm0, %v58_v28  ;;  %v193_v31 = vld [vmem:[%s978_s5] sm:$0xff]  ;;  %v194_v32 = vld [vmem:[%s978_s5 + $0x8] sm:$0xff] }
  0x2d   :  { %447 = vmatpush1.bf16.msra.mxu0 %v446_v14  ;;  %v80_v33 = vld [vmem:[%s976_s3 + $0xa8] sm:$0xff]  ;;  %v82_v34 = vld [vmem:[%s976_s3 + $0xb8] sm:$0xff]  ;;  %v477_v35 = vpack.c.bf16 %v194_v32, %v193_v31  ;;  %v195_v36 = vld [vmem:[%s978_s5 + $0x10] sm:$0xff]  ;;  %v458_v38 = vpack.c.bf16 %v77_v30, %v75_v27 }
  0x2e   :  { %449 = vmatprep.subr.bf16.mxu0 %v448_v15  ;;  %v196_v37 = vld [vmem:[%s978_s5 + $0x18] sm:$0xff]  ;;  %v79_v39 = vld [vmem:[%s976_s3 + $0xa0] sm:$0xff]  ;;  %v460_v41 = vpack.c.bf16 %v82_v34, %v80_v33  ;;  %v81_v42 = vld [vmem:[%s976_s3 + $0xb0] sm:$0xff] }
  0x2f   :  { %478 = vmatpush1.bf16.msra.mxu1 %v477_v35  ;;  %v480_v40 = vpack.c.bf16 %v196_v37, %v195_v36  ;;  %v197_v43 = vld [vmem:[%s978_s5 + $0x20] sm:$0xff]  ;;  %v198_v44 = vld [vmem:[%s978_s5 + $0x28] sm:$0xff]  ;;  %v86_v46 = vld [vmem:[%s976_s3 + $0xd8] sm:$0xff]  ;;  %v462_v47 = vpack.c.bf16 %v81_v42, %v79_v39 }
  0x30   :  { %479 = vmatprep.subr.bf16.mxu1 %v613_v0  ;;  %v84_v45 = vld [vmem:[%s976_s3 + $0xc8] sm:$0xff]  ;;  %v83_v48 = vld [vmem:[%s976_s3 + $0xc0] sm:$0xff]  ;;  %v483_v49 = vpack.c.bf16 %v198_v44, %v197_v43  ;;  %v85_v51 = vld [vmem:[%s976_s3 + $0xd0] sm:$0xff] }
  0x31   :  { %451 = vmatpush1.bf16.msra.mxu0 %v450_v20  ;;  %v464_v50 = vpack.c.bf16 %v86_v46, %v84_v45  ;;  %v199_v52 = vld [vmem:[%s978_s5 + $0x30] sm:$0xff]  ;;  %v200_v53 = vld [vmem:[%s978_s5 + $0x38] sm:$0xff]  ;;  %v88_v54 = vld [vmem:[%s976_s3 + $0xe8] sm:$0xff]  ;;  %v466_v56 = vpack.c.bf16 %v85_v51, %v83_v48 }
  0x32   :  { %453 = vmatprep.subr.bf16.mxu0 %v452_v21  ;;  %v90_v55 = vld [vmem:[%s976_s3 + $0xf8] sm:$0xff]  ;;  %v87_v57 = vld [vmem:[%s976_s3 + $0xe0] sm:$0xff]  ;;  %v486_v58 = vpack.c.bf16 %v200_v53, %v199_v52  ;;  %v89_v60 = vld [vmem:[%s976_s3 + $0xf0] sm:$0xff]  ;;  %v99_v52 = vlaneseq }
  0x33   :  { %481 = vmatpush1.bf16.msra.mxu1 %v480_v40  ;;  %v468_v59 = vpack.c.bf16 %v90_v55, %v88_v54  ;;  %v201_v61 = vld [vmem:[%s978_s5 + $0x40] sm:$0xff]  ;;  %v202_v62 = vld [vmem:[%s978_s5 + $0x48] sm:$0xff]  ;;  %v94_v1 = vld [vmem:[%s976_s3 + $0x118] sm:$0xff]  ;;  %v470_v2 = vpack.c.bf16 %v89_v60, %v87_v57 }
  0x34   :  { %482 = vmatprep.subr.bf16.mxu1 %v613_v0  ;;  %v92_v63 = vld [vmem:[%s976_s3 + $0x108] sm:$0xff]  ;;  %v91_v3 = vld [vmem:[%s976_s3 + $0x100] sm:$0xff]  ;;  %v489_v4 = vpack.c.bf16 %v202_v62, %v201_v61  ;;  %v93_v6 = vld [vmem:[%s976_s3 + $0x110] sm:$0xff]  ;;  %v100_v53 = vshrl.u32 %v99_v52, 7 }
  0x35   :  { %455 = vmatpush1.bf16.msra.mxu0 %v454_v26  ;;  %v472_v5 = vpack.c.bf16 %v94_v1, %v92_v63  ;;  %v203_v7 = vld [vmem:[%s978_s5 + $0x50] sm:$0xff]  ;;  %v204_v8 = vld [vmem:[%s978_s5 + $0x58] sm:$0xff]  ;;  %v474_v9 = vpack.c.bf16 %v93_v6, %v91_v3  ;;  %v205_v11 = vld [vmem:[%s978_s5 + $0x60] sm:$0xff] }
  0x36   :  { %457 = vmatprep.subr.bf16.mxu0 %v456_v29  ;;  %v492_v10 = vpack.c.bf16 %v204_v8, %v203_v7  ;;  %v206_v12 = vld [vmem:[%s978_s5 + $0x68] sm:$0xff]  ;;  %v295_v14 = vld [vmem:[%s980_s7] sm:$0xff]  ;;  %v207_v18 = vld [vmem:[%s978_s5 + $0x70] sm:$0xff]  ;;  %v101_v54 = vsub.s32 0, %v100_v53 }
  0x37   :  { %484 = vmatpush1.bf16.msra.mxu1 %v483_v49  ;;  %v96_v13 = vld [vmem:[%s976_s3 + $0x128] sm:$0x3f]  ;;  %v495_v16 = vpack.c.bf16 %v206_v12, %v205_v11  ;;  %v95_v17 = vld [vmem:[%s976_s3 + $0x120] sm:$0x3f]  ;;  %v208_v19 = vld [vmem:[%s978_s5 + $0x78] sm:$0xff] }
  0x38   :  { %485 = vmatprep.subr.bf16.mxu1 %v613_v0  ;;  %v296_v15 = vld [vmem:[%s980_s7 + $0x8] sm:$0xff]  ;;  %v57_v20 = vld [vmem:[%s973_s0] sm:$0xff]  ;;  %v297_v22 = vld [vmem:[%s980_s7 + $0x10] sm:$0xff]  ;;  %v498_v24 = vpack.c.bf16 %v208_v19, %v207_v18 }
  0x39   :  { %459 = vmatpush1.bf16.msra.mxu0 %v458_v38  ;;  %v504_v21 = vpack.c.bf16 %v296_v15, %v295_v14  ;;  %v298_v23 = vld [vmem:[%s980_s7 + $0x18] sm:$0xff]  ;;  %v299_v26 = vld [vmem:[%s980_s7 + $0x20] sm:$0xff]  ;;  %v300_v27 = vld [vmem:[%s980_s7 + $0x28] sm:$0xff] }
  0x3a   :  { %461 = vmatprep.subr.bf16.mxu0 %v460_v41  ;;  %v507_v25 = vpack.c.bf16 %v298_v23, %v297_v22  ;;  %v510_v28 = vpack.c.bf16 %v300_v27, %v299_v26  ;;  %v301_v29 = vld [vmem:[%s980_s7 + $0x30] sm:$0xff]  ;;  %v302_v30 = vld [vmem:[%s980_s7 + $0x38] sm:$0xff]  ;;  %v303_v32 = vld [vmem:[%s980_s7 + $0x40] sm:$0xff] }
  0x3b   :  { %487 = vmatpush1.bf16.msra.mxu1 %v486_v58  ;;  %v513_v31 = vpack.c.bf16 %v302_v30, %v301_v29  ;;  %v304_v33 = vld [vmem:[%s980_s7 + $0x48] sm:$0xff]  ;;  %v305_v35 = vld [vmem:[%s980_s7 + $0x50] sm:$0xff]  ;;  %v306_v36 = vld [vmem:[%s980_s7 + $0x58] sm:$0xff] }
  0x3c   :  { %488 = vmatprep.subr.bf16.mxu1 %v613_v0  ;;  %v516_v34 = vpack.c.bf16 %v304_v33, %v303_v32  ;;  %v519_v37 = vpack.c.bf16 %v306_v36, %v305_v35  ;;  %v307_v38 = vld [vmem:[%s980_s7 + $0x60] sm:$0xff]  ;;  %v308_v39 = vld [vmem:[%s980_s7 + $0x68] sm:$0xff]  ;;  %v309_v41 = vld [vmem:[%s980_s7 + $0x70] sm:$0xff] }
  0x3d   :  { %463 = vmatpush1.bf16.msra.mxu0 %v462_v47  ;;  %v522_v40 = vpack.c.bf16 %v308_v39, %v307_v38  ;;  %v310_v42 = vld [vmem:[%s980_s7 + $0x78] sm:$0xff]  ;;  %v209_v44 = vld [vmem:[%s978_s5 + $0x80] sm:$0xff]  ;;  %v210_v45 = vld [vmem:[%s978_s5 + $0x88] sm:$0xff] }
  0x3e   :  { %465 = vmatprep.subr.bf16.mxu0 %v464_v50  ;;  %v525_v43 = vpack.c.bf16 %v310_v42, %v309_v41  ;;  %v311_v46 = vld [vmem:[%s980_s7 + $0x80] sm:$0xff]  ;;  %v501_v47 = vpack.c.bf16 %v210_v45, %v209_v44  ;;  %v312_v48 = vld [vmem:[%s980_s7 + $0x88] sm:$0xff]  ;;  %v614_v50 = vmov 0.0   ;;  %v313_v51 = vld [vmem:[%s980_s7 + $0x90] sm:$0x3f] }
  0x3f   :  { %490 = vmatpush1.bf16.msra.mxu1 %v489_v4  ;;  %v528_v49 = vpack.c.bf16 %v312_v48, %v311_v46  ;;  %v97_v55 = vld [vmem:[%s977_s4] sm:$0x3]  ;;  %v400_v14 = vld [vmem:[#allocation5] sm:$0xff] }
  0x40   :  { %491 = vmatprep.subr.bf16.mxu1 %v613_v0  ;;  %v102_v57 = vrot.slane %v97_v55, %v101_v54  ;;  %v434_v3 = vld [vmem:[%s979_s6] ss:$0 sm:$0xff]  ;;  %s618_s6 = smov [#allocation7]  }
  0x41   :  { %467 = vmatpush1.bf16.msra.mxu0 %v466_v56  ;;  %v105_v56 = vsub.s32 1, %v100_v53  ;;  %v437_v4 = vld [vmem:[%s981_s8] ss:$0 sm:$0xff]  ;;  %s421_s29 = sshll.u32 %s618_s6, 4  ;;  %s422_s29 = int_to_ptr.vmem [resolvable:$true] %s421_s29 }
  0x42   :  { %469 = vmatprep.subr.bf16.mxu0 %v468_v59  ;;  %s583_s8 = scalar_lea.vmem %s422_s29, 128  ;;  %p588_p3 = scmp.lt.s32.totalorder %s422_s29, %s422_s29 }
  0x43   :  { %493 = vmatpush1.bf16.msra.mxu1 %v492_v10  ;;  %v106_v58 = vrot.slane %v97_v55, %v105_v56  ;;  %p584_p2 = scmp.ne.s32.totalorder %s422_s29, %s583_s8  ;;  %p589_p4 = scmp.lt.s32.totalorder %s583_s8, %s583_s8 }
  0x44   :  { %494 = vmatprep.subr.bf16.mxu1 %v613_v0 }
  0x45   :  { %471 = vmatpush1.bf16.msra.mxu0 %v470_v2  ;;  %v615_v2 = vmov 0   ;;  %p590_p5 = por %p589_p4, %p588_p3 }
  0x46   :  { %473 = vmatprep.subr.bf16.mxu0 %v472_v5  ;;  %538 = vset.pattern.permute.xlu0 %v615_v2 }
  0x47   :  { %496 = vmatpush1.bf16.msra.mxu1 %v495_v16  ;;  %p591_p6 = pnand %p590_p5, %p584_p2 }
  0x48   :  { %497 = vmatprep.subr.bf16.mxu1 %v613_v0 }
  0x49   :  { %475 = vmatpush1.bf16.msra.mxu0 %v474_v9 }
  0x4a   :  { %431 = vmatprep.subr.msk.mxu0 %vm113_vm1, %v96_v13  ;;  %v399_v13 = vld [vmem:[#allocation2] sm:$0xff] }
  0x4b   :  { %499 = vmatpush1.bf16.msra.mxu1 %v498_v24 }
  0x4c   :  { %500 = vmatprep.subr.bf16.mxu1 %v613_v0 }
  0x4d   :  { %432 = vmatpush1.msk.msra.mxu0 %vm113_vm1, %v95_v17 }
  0x4e   :  { %185 = vmatmul.mubr.f32.vlgmr.msra.gmra.mrb[0].mxu0 %v57_v20  ;;  %503 = vmatprep.subr.bf16.mxu0 %v613_v0 }
  0x4f   :  { %505 = vmatpush1.bf16.msra.mxu0 %v504_v21  ;;  %502 = vmatpush1.bf16.msra.mxu1 %v501_v47 }
  0x50   :  { %506 = vmatprep.subr.bf16.mxu0 %v613_v0  ;;  %261 = vmatprep.subr.mxu1 %v614_v50 }
  0x53   :  { %508 = vmatpush1.bf16.msra.mxu0 %v507_v25 }
  0x54   :  { %509 = vmatprep.subr.bf16.mxu0 %v613_v0 }
  0x57   :  { %511 = vmatpush1.bf16.msra.mxu0 %v510_v28 }
  0x58   :  { %512 = vmatprep.subr.bf16.mxu0 %v613_v0 }
  0x5b   :  { %514 = vmatpush1.bf16.msra.mxu0 %v513_v31 }
  0x5c   :  { %515 = vmatprep.subr.bf16.mxu0 %v613_v0 }
  0x5f   :  { %517 = vmatpush1.bf16.msra.mxu0 %v516_v34 }
  0x60   :  { %518 = vmatprep.subr.bf16.mxu0 %v613_v0 }
  0x63   :  { %520 = vmatpush1.bf16.msra.mxu0 %v519_v37 }
  0x64   :  { %521 = vmatprep.subr.bf16.mxu0 %v613_v0 }
  0x67   :  { %523 = vmatpush1.bf16.msra.mxu0 %v522_v40 }
  0x68   :  { %524 = vmatprep.subr.bf16.mxu0 %v613_v0 }
  0x6b   :  { %526 = vmatpush1.bf16.msra.mxu0 %v525_v43 }
  0x6c   :  { %527 = vmatprep.subr.bf16.mxu0 %v613_v0  ;;  %v211_v0 = vld [vmem:[%s978_s5 + $0x90] sm:$0x3f] }
  0x6d   :  { %435 = vmatpush1.msk.msra.mxu1 %vm113_vm1, %v211_v0 }
  0x6f   :  { %529 = vmatpush1.bf16.msra.mxu0 %v528_v49 }
  0x70   :  { %360 = vmatprep.subr.mxu0 %v614_v50 }
  0x73   :  { %438 = vmatpush1.msk.msra.mxu0 %vm113_vm1, %v313_v51 }
 0x121   :  { %v186_v59 = vpop.f32.mrb[0].mxu0 }
 0x122   :  { %v187_v60 = vadd.f32 %v186_v59, %v102_v57  ;;  %v188_v61 = vpop.f32.mrb[1].mxu0 }
 0x123   :  { %v189_v62 = vadd.f32 %v188_v61, %v106_v58 }
 0x124   :  { %v191_v1 = vmax.f32 %v187_v60, 0.0 }
 0x125   :  { %v192_v63 = vmax.f32 %v189_v62, 0.0 }
 0x127   :  { %436 = vmatprep.mubr.msk.f32.mxu1 %vm109_vm0, %v192_v63  ;;  %439 = vmatprep.mubr.msk.f32.mxu0 %vm109_vm0, %v192_v63 }
 0x128   :  { %290 = vmatmul.mubr.f32.vlgmr.msra.gmra.mrb[0].mxu1 %v191_v1  ;;  %389 = vmatmul.mubr.f32.vlgmr.msra.gmra.mrb[2].mxu0 %v191_v1 }
 0x1fb   :  { %v291_v5 = vpop.f32.mrb[0].mxu1  ;;  %v390_v6 = vpop.f32.mrb[2].mxu0 }
 0x1fc   :  { %v292_v7 = vadd.f32 %v434_v3, %v291_v5  ;;  %v391_v8 = vadd.f32 %v437_v4, %v390_v6  ;;  %v293_v9 = vpop.f32.mrb[1].mxu1  ;;  %v392_v10 = vpop.f32.mrb[3].mxu0 }
 0x1fe   :  { %408 = vrot.lane.b32.xlu1 %v391_v8, %s616_s27  ;;  %395 = vrot.lane.b32.xlu0 %v292_v7, %s617_s28 }
 0x270   :  { %v396_v11 = vpop.permute.xlu0 %395  ;;  %v409_v16 = vpop.permute.xlu1 %408 }
 0x271   :  { %vm398_vm2 = vcmp.ge.f32.partialorder %v292_v7, %v396_v11 }
 0x272   :  { %v401_v12 = vsel %vm398_vm2, 1, %v615_v2 }
 0x273   :  { %403 = vperm.xlu0 %538, %v401_v12  }
 0x2f2   :  { %v404_v15 = vpop.permute.xlu0 %403 }
 0x2f3   :  { %vm405_vm4 = vcmp.eq.s32.totalorder %v404_v15, 1 }
 0x2f4   :  { %v406_v17 = vsel %vm405_vm4, %v399_v13, %v400_v14 }
 0x2f5   :  { %v412_v18 = vsel %vm411_vm3, %v406_v17, %v409_v16 }
 0x2f6   :  { %414 = vst.msk [vmem:[#allocation7] sm:$0xff] %vm413_vm5, %v412_v18 }
 0x2f7   :  { %594 = shalt.err (!%p591_p6)
}
 0x2f8   :  { %s595_s10 = scalar_lea.hbm %s982_s9, 128 }
 0x2f9   :  { %p596_p7 = scmp.ne.s32.totalorder %s982_s9, %s595_s10  ;;  %p599_p8 = scmp.lt.u32.totalorder %s595_s10, %s982_s9 }
 0x2fb   :  { %p601_p9 = pnand %p599_p8, %p596_p7 }
 0x2fd   :  { %604 = shalt.err (!%p601_p9)
}
 0x2fe   :  { %424 = dma.vmem_to_hbm [thread:$0]  %s422_s29, 128, %s982_s9, [#allocation4]  }
 0x2ff   :  { %609 = dma.done.wait [#allocation4], 128  }
 0x300   :  { %610 = vsyncadd [#allocation4], 4294967168 }
 0x301   :  { %428 = vsyncpa [#allocation3], 1 }
 0x302   :  { %429 = vsyncpa [#allocation6], 1 }
 0x303   :  { %430 = vsyncpa [#allocation4], 1 }

</bundles_post_ra>
